<compile_context>
chip_gen: v6e
topology: v6e:2x2x1
jax: 0.10.0
libtpu: 0.0.40
codegen_flags: <defaults>
</compile_context>

<pallas_src>
import functools

import jax
import jax.numpy as jnp
from jax.experimental import pallas as pl
from jax.experimental.pallas import tpu as pltpu

_LANE = 128


# ---------------------------------------------------------------------------
# Hardware / tiling helpers (all plain Python on static shapes).
# ---------------------------------------------------------------------------
def _query_vmem_capacity():
    """Physical per-core VMEM bytes; conservative (v7x = 64 MiB) if unknown."""
    try:
        info = pltpu.get_tpu_info()
        cap = getattr(info, "vmem_capacity_bytes", None)
        if cap:
            return int(cap)
    except Exception:
        pass
    return 64 << 20


def _largest_divisor_multiple(dim, base, cap):
    """Largest multiple of `base` that divides `dim` and is <= cap (0 if none)."""
    cap = min(cap, dim)
    best = 0
    t = base
    while t <= cap:
        if dim % t == 0:
            best = t
        t += base
    return best


def _pick_row_block(R, base, cap, min_blocks=1):
    """Row block: multiple of `base`, divides R, <= cap.

    If `min_blocks` > 1 and R allows it, prefer a (possibly smaller) block
    that yields at least `min_blocks` iterations along the row axis so the
    'parallel' grid axis can be sharded across v7x's two TensorCores.
    Falls back to the full extent when R is not a multiple of `base`.
    """
    if R % base != 0:
        return R
    cap = max(base, min(cap, R))
    best = base
    t = base
    while t <= cap:
        if R % t == 0:
            best = t
        t += base
    if R // best < min_blocks and R >= min_blocks * base:
        t = (R // min_blocks) // base * base
        while t >= base:
            if R % t == 0:
                return t
            t -= base
    return best


def _compiler_params(n_buffered_blocks, block_bytes, extra_bytes, semantics,
                     vmem_cap, base_limit):
    """Scoped-VMEM limit: generation-aware base, raised to fit this kernel's
    double-buffered blocks, clamped below physical VMEM."""
    need = n_buffered_blocks * block_bytes + extra_bytes + (4 << 20)
    limit = max(base_limit, need)
    limit = min(limit, (vmem_cap * 9) // 10)
    limit = max(limit, 32 << 20)
    return pltpu.CompilerParams(
        dimension_semantics=semantics, vmem_limit_bytes=int(limit)
    )


# ---------------------------------------------------------------------------
# Kernel 1: per-row (= per (n, c)) sum and sum-of-squares over the H*W axis.
# ---------------------------------------------------------------------------
def _sum_square_kernel(x_ref, out_ref, acc_s, acc_q):
    h = pl.program_id(1)
    tile = x_ref.shape[-1]

    if tile % _LANE == 0:
        # Hot path: accumulate 128-lane slabs elementwise (pure VPU adds;
        # no per-step XLU cross-lane reduce, no lane-width-1 read-modify-write).
        @pl.when(h == 0)
        def _():
            acc_s[...] = jnp.zeros_like(acc_s)
            acc_q[...] = jnp.zeros_like(acc_q)

        for j in range(tile // _LANE):
            xs = x_ref[:, j * _LANE:(j + 1) * _LANE].astype(jnp.float32)
            acc_s[...] += xs
            acc_q[...] += xs * xs

        # Single cross-lane reduce + tiny (block_rows, 2) store at the end.
        @pl.when(h == pl.num_programs(1) - 1)
        def _():
            out_ref[:, 0:1] = jnp.sum(acc_s[...], axis=1, keepdims=True)
            out_ref[:, 1:2] = jnp.sum(acc_q[...], axis=1, keepdims=True)
    else:
        # Ragged H*W fallback: the wrapper sets tile_hw == H*W, so there is
        # exactly one step along the reduction axis; reduce directly.
        x = x_ref[...].astype(jnp.float32)
        out_ref[:, 0:1] = jnp.sum(x, axis=1, keepdims=True)
        out_ref[:, 1:2] = jnp.sum(x * x, axis=1, keepdims=True)


def sum_square_rows(x2d, *, block_rows, tile_hw, vmem_cap, base_limit):
    """x2d: (R, M) -> (R, 2) float32 with [:, 0] = rowsum, [:, 1] = rowsq."""
    R, M = x2d.shape
    grid = (R // block_rows, M // tile_hw)
    block_bytes = block_rows * tile_hw * x2d.dtype.itemsize
    acc_bytes = 2 * block_rows * _LANE * 4 + 4 * block_rows * 2 * 4
    cost = pl.CostEstimate(
        flops=3 * R * M, transcendentals=0,
        bytes_accessed=x2d.size * x2d.dtype.itemsize + R * 2 * 4,
    )
    return pl.pallas_call(
        _sum_square_kernel,
        out_shape=jax.ShapeDtypeStruct((R, 2), jnp.float32),
        grid_spec=pltpu.PrefetchScalarGridSpec(
            num_scalar_prefetch=0,
            grid=grid,
            in_specs=[pl.BlockSpec((block_rows, tile_hw), lambda r, h: (r, h))],
            out_specs=pl.BlockSpec((block_rows, 2), lambda r, h: (r, 0)),
            scratch_shapes=[
                pltpu.VMEM((block_rows, _LANE), jnp.float32),
                pltpu.VMEM((block_rows, _LANE), jnp.float32),
            ],
        ),
        # Row axis is "parallel" (megacore-shardable on v7x); the H*W
        # reduction axis is last and "arbitrary" (output accumulator).
        compiler_params=_compiler_params(
            2, block_bytes, acc_bytes, ("parallel", "arbitrary"),
            vmem_cap, base_limit,
        ),
        cost_estimate=cost,
    )(x2d)


# ---------------------------------------------------------------------------
# Kernel 2: elementwise normalization  y = x * scale + shift.
# ---------------------------------------------------------------------------
def _bn_apply_kernel(x_ref, scale_ref, shift_ref, o_ref):
    x = x_ref[...].astype(jnp.float32)
    o_ref[...] = (x * scale_ref[...] + shift_ref[...]).astype(o_ref.dtype)


def bn_apply(x2d, scale_rows, shift_rows, *, block_rows, tile_hw,
             vmem_cap, base_limit):
    """x2d: (R, M); scale/shift: (R, 1) float32. Returns (R, M) in x2d.dtype."""
    R, M = x2d.shape
    grid = (R // block_rows, M // tile_hw)
    block_bytes = block_rows * tile_hw * x2d.dtype.itemsize
    per_row_spec = pl.BlockSpec((block_rows, 1), lambda r, h: (r, 0))
    cost = pl.CostEstimate(
        flops=2 * R * M, transcendentals=0,
        bytes_accessed=2 * x2d.size * x2d.dtype.itemsize + 2 * R * 4,
    )
    return pl.pallas_call(
        _bn_apply_kernel,
        out_shape=jax.ShapeDtypeStruct((R, M), x2d.dtype),
        grid_spec=pltpu.PrefetchScalarGridSpec(
            num_scalar_prefetch=0,
            grid=grid,
            in_specs=[
                pl.BlockSpec((block_rows, tile_hw), lambda r, h: (r, h)),
                per_row_spec,
                per_row_spec,
            ],
            out_specs=pl.BlockSpec((block_rows, tile_hw), lambda r, h: (r, h)),
        ),
        compiler_params=_compiler_params(
            4, block_bytes, 8 * block_rows * 4, ("parallel", "parallel"),
            vmem_cap, base_limit,
        ),
        cost_estimate=cost,
    )(x2d, scale_rows, shift_rows)


# ---------------------------------------------------------------------------
# Module wrapper (training-mode forward of encoding.nn.BatchNorm2d).
# ---------------------------------------------------------------------------
@functools.partial(jax.jit, static_argnames=("eps", "momentum"))
def batchnorm2d_train(x, weight, bias, running_mean, running_var,
                      eps=1e-5, momentum=0.1):
    """x: (N, C, H, W).  Returns (y, new_running_mean, new_running_var)."""
    N, C, H, W = x.shape
    Ncnt = N * H * W
    R, M = N * C, H * W

    # NCHW -> (N*C, H*W): a free reshape, no HBM data movement.
    x2d = x.reshape(R, M)

    itemsize = int(jnp.dtype(x.dtype).itemsize)
    # Sub-32-bit dtypes pack along sublanes: keep row blocks full packed vregs.
    row_base = {4: 8, 2: 16, 1: 32}.get(itemsize, 8)

    # Generation-aware VMEM budget (~48 MiB limit on v7x, ~96 MiB on v5e/v6e);
    # per-block budget keeps kernel 2's double-buffered in+out well inside it.
    vmem_cap = _query_vmem_capacity()
    base_limit = max(32 << 20, min(vmem_cap * 3 // 4, 96 << 20))
    block_budget = base_limit // 6

    if M % _LANE == 0:
        lane_cap = min(
            4096,
            max(_LANE, (block_budget // (row_base * itemsize)) // _LANE * _LANE),
        )
        tile_hw = _largest_divisor_multiple(M, _LANE, lane_cap) or M
    else:
        # TODO(synk): pad/mask the ragged H*W tail instead of a full-extent
        # lane block (keeps kernel 2's stores fully lane-dense).
        tile_hw = M

    rows_cap = max(
        row_base,
        min(1024, (block_budget // (tile_hw * itemsize)) // row_base * row_base),
    )
    h_steps = M // tile_hw
    # Kernel 1's only parallel axis is rows: prefer >=2 row blocks (v7x has
    # 2 TensorCores).  Kernel 2 can also shard its (parallel) H*W axis, so it
    # only needs the split when the H*W axis has a single step.
    block_rows_1 = _pick_row_block(R, row_base, rows_cap, min_blocks=2)
    block_rows_2 = _pick_row_block(
        R, row_base, rows_cap, min_blocks=2 if h_steps < 2 else 1)

    # Hot path 1: per-row reduction (Pallas kernel).
    rowstats = sum_square_rows(
        x2d, block_rows=block_rows_1, tile_hw=tile_hw,
        vmem_cap=vmem_cap, base_limit=base_limit)              # (R, 2)

    # O(N*C) glue: fold rows -> channels, compute statistics.
    stats = rowstats.reshape(N, C, 2)
    xsum = jnp.sum(stats[..., 0], axis=0)                      # (C,)
    xsquare = jnp.sum(stats[..., 1], axis=0)                   # (C,)

    mean = xsum / Ncnt                                         # (C,)
    # Clamp: E[x^2]-E[x]^2 can go slightly negative from cancellation.
    # TODO(synk): two-pass centered variance / Kahan accumulation for very
    # large N*H*W with large mean offsets.
    sumvar = jnp.maximum(xsquare - xsum * xsum / Ncnt, 0.0)    # (C,)
    unbias_var = sumvar / max(Ncnt - 1, 1)                     # (C,)
    std = jnp.sqrt(sumvar / Ncnt + eps)                        # (C,)

    new_running_mean = (1.0 - momentum) * running_mean + momentum * mean
    new_running_var = (1.0 - momentum) * running_var + momentum * unbias_var

    # Fold affine + normalization into scale/shift (removes per-element div).
    gamma = weight.astype(jnp.float32)
    beta = bias.astype(jnp.float32)
    scale = gamma / std                                        # (C,)
    shift = beta - mean * scale                                # (C,)
    scale_rows = jnp.broadcast_to(scale[None, :], (N, C)).reshape(R, 1)
    shift_rows = jnp.broadcast_to(shift[None, :], (N, C)).reshape(R, 1)

    # Hot path 2: elementwise normalization (Pallas kernel).
    y2d = bn_apply(x2d, scale_rows, shift_rows,
                   block_rows=block_rows_2, tile_hw=tile_hw,
                   vmem_cap=vmem_cap, base_limit=base_limit)   # (N*C, H*W)

    # (N*C, H*W) -> NCHW: free reshape again.
    y = y2d.reshape(N, C, H, W)
    return y, new_running_mean, new_running_var


if __name__ == "__main__":
    key = jax.random.PRNGKey(0)
    kx, kw = jax.random.split(key)

    N, C, H, W = 2, 4, 16, 16
    eps, momentum = 1e-5, 0.1

    x = jax.random.normal(kx, (N, C, H, W), dtype=jnp.float32)

    # Deterministic parameter init matching reset_parameters():
    #   weight ~ U[0,1), bias = 0, running_mean = 0, running_var = 1.
    weight = jax.random.uniform(kw, (C,), dtype=jnp.float32)
    bias = jnp.zeros((C,), dtype=jnp.float32)
    running_mean = jnp.zeros((C,), dtype=jnp.float32)
    running_var = jnp.ones((C,), dtype=jnp.float32)

    y, new_rm, new_rv = batchnorm2d_train(
        x, weight, bias, running_mean, running_var, eps=eps, momentum=momentum
    )
    jax.block_until_ready((y, new_rm, new_rv))

    # Pure-JAX reference check of the same semantics.
    Ncnt = N * H * W
    xs = jnp.sum(x, axis=(0, 2, 3))
    xsq = jnp.sum(x * x, axis=(0, 2, 3))
    mean_r = xs / Ncnt
    sumvar_r = xsq - xs * xs / Ncnt
    std_r = jnp.sqrt(sumvar_r / Ncnt + eps)
    y_ref = (x - mean_r[None, :, None, None]) / std_r[None, :, None, None] \
        * weight[None, :, None, None] + bias[None, :, None, None]
    rm_ref = (1 - momentum) * running_mean + momentum * mean_r
    rv_ref = (1 - momentum) * running_var + momentum * (sumvar_r / (Ncnt - 1))

    assert jnp.allclose(y, y_ref, atol=1e-4, rtol=1e-4)
    assert jnp.allclose(new_rm, rm_ref, atol=1e-5, rtol=1e-5)
    assert jnp.allclose(new_rv, rv_ref, atol=1e-5, rtol=1e-5)

    print("KERNEL_OK")
</pallas_src>

<mosaic_0001>
module attributes {stable_mosaic.version = 11 : i64} {
  func.func @_sum_square_kernel(%arg0: i32, %arg1: i32, %arg2: memref<8x256xf32, #tpu.memory_space<vmem>>, %arg3: memref<8x2xf32, #tpu.memory_space<vmem>>, %arg4: memref<8x128xf32, #tpu.memory_space<vmem>>, %arg5: memref<8x128xf32, #tpu.memory_space<vmem>>) attributes {dimension_semantics = [#tpu.dimension_semantics<parallel>, #tpu.dimension_semantics<arbitrary>], iteration_bounds = array<i64: 1, 1>, scalar_prefetch = 0 : i64, scratch_operands = 2 : i64, tpu.core_type = #tpu.core_type<tc>, window_params = [{transform_indices = @transform_0, window_bounds = array<i64: 8, 256>}, {transform_indices = @transform_1, window_bounds = array<i64: 8, 2>}]} {
    %c0_i32 = arith.constant 0 : i32
    %0 = arith.cmpi eq, %arg1, %c0_i32 : i32
    %1 = arith.extui %0 : i1 to i32
    %c0_i32_0 = arith.constant 0 : i32
    %2 = arith.cmpi ne, %1, %c0_i32_0 : i32
    scf.if %2 {
      %cst = arith.constant 0.000000e+00 : f32
      %22 = vector.broadcast %cst : f32 to vector<8x128xf32>
      %c0_21 = arith.constant 0 : index
      %c0_22 = arith.constant 0 : index
      %23 = vector.load %arg4[%c0_21, %c0_22] : memref<8x128xf32, #tpu.memory_space<vmem>>, vector<8x128xf32>
      tpu.vector_store %arg4[%c0_21, %c0_22], %22 {strides = array<i32>} : memref<8x128xf32, #tpu.memory_space<vmem>>, vector<8x128xf32>,
      %cst_23 = arith.constant 0.000000e+00 : f32
      %24 = vector.broadcast %cst_23 : f32 to vector<8x128xf32>
      %c0_24 = arith.constant 0 : index
      %c0_25 = arith.constant 0 : index
      %25 = vector.load %arg5[%c0_24, %c0_25] : memref<8x128xf32, #tpu.memory_space<vmem>>, vector<8x128xf32>
      tpu.vector_store %arg5[%c0_24, %c0_25], %24 {strides = array<i32>} : memref<8x128xf32, #tpu.memory_space<vmem>>, vector<8x128xf32>,
    } else {
    }
    %c0 = arith.constant 0 : index
    %c0_1 = arith.constant 0 : index
    %3 = vector.load %arg2[%c0, %c0_1] : memref<8x256xf32, #tpu.memory_space<vmem>>, vector<8x128xf32>
    %c0_2 = arith.constant 0 : index
    %c0_3 = arith.constant 0 : index
    %4 = vector.load %arg4[%c0_2, %c0_3] : memref<8x128xf32, #tpu.memory_space<vmem>>, vector<8x128xf32>
    %5 = arith.addf %4, %3 : vector<8x128xf32>
    %c0_4 = arith.constant 0 : index
    %c0_5 = arith.constant 0 : index
    %6 = vector.load %arg4[%c0_4, %c0_5] : memref<8x128xf32, #tpu.memory_space<vmem>>, vector<8x128xf32>
    tpu.vector_store %arg4[%c0_4, %c0_5], %5 {strides = array<i32>} : memref<8x128xf32, #tpu.memory_space<vmem>>, vector<8x128xf32>,
    %c0_6 = arith.constant 0 : index
    %c0_7 = arith.constant 0 : index
    %7 = vector.load %arg5[%c0_6, %c0_7] : memref<8x128xf32, #tpu.memory_space<vmem>>, vector<8x128xf32>
    %8 = arith.mulf %3, %3 : vector<8x128xf32>
    %9 = arith.addf %7, %8 : vector<8x128xf32>
    %c0_8 = arith.constant 0 : index
    %c0_9 = arith.constant 0 : index
    %10 = vector.load %arg5[%c0_8, %c0_9] : memref<8x128xf32, #tpu.memory_space<vmem>>, vector<8x128xf32>
    tpu.vector_store %arg5[%c0_8, %c0_9], %9 {strides = array<i32>} : memref<8x128xf32, #tpu.memory_space<vmem>>, vector<8x128xf32>,
    %c0_10 = arith.constant 0 : index
    %c128 = arith.constant 128 : index
    %11 = vector.load %arg2[%c0_10, %c128] : memref<8x256xf32, #tpu.memory_space<vmem>>, vector<8x128xf32>
    %c0_11 = arith.constant 0 : index
    %c0_12 = arith.constant 0 : index
    %12 = vector.load %arg4[%c0_11, %c0_12] : memref<8x128xf32, #tpu.memory_space<vmem>>, vector<8x128xf32>
    %13 = arith.addf %12, %11 : vector<8x128xf32>
    %c0_13 = arith.constant 0 : index
    %c0_14 = arith.constant 0 : index
    %14 = vector.load %arg4[%c0_13, %c0_14] : memref<8x128xf32, #tpu.memory_space<vmem>>, vector<8x128xf32>
    tpu.vector_store %arg4[%c0_13, %c0_14], %13 {strides = array<i32>} : memref<8x128xf32, #tpu.memory_space<vmem>>, vector<8x128xf32>,
    %c0_15 = arith.constant 0 : index
    %c0_16 = arith.constant 0 : index
    %15 = vector.load %arg5[%c0_15, %c0_16] : memref<8x128xf32, #tpu.memory_space<vmem>>, vector<8x128xf32>
    %16 = arith.mulf %11, %11 : vector<8x128xf32>
    %17 = arith.addf %15, %16 : vector<8x128xf32>
    %c0_17 = arith.constant 0 : index
    %c0_18 = arith.constant 0 : index
    %18 = vector.load %arg5[%c0_17, %c0_18] : memref<8x128xf32, #tpu.memory_space<vmem>>, vector<8x128xf32>
    tpu.vector_store %arg5[%c0_17, %c0_18], %17 {strides = array<i32>} : memref<8x128xf32, #tpu.memory_space<vmem>>, vector<8x128xf32>,
    %c0_i32_19 = arith.constant 0 : i32
    %19 = arith.cmpi eq, %arg1, %c0_i32_19 : i32
    %20 = arith.extui %19 : i1 to i32
    %c0_i32_20 = arith.constant 0 : i32
    %21 = arith.cmpi ne, %20, %c0_i32_20 : i32
    scf.if %21 {
      %c0_21 = arith.constant 0 : index
      %c0_22 = arith.constant 0 : index
      %22 = vector.load %arg4[%c0_21, %c0_22] : memref<8x128xf32, #tpu.memory_space<vmem>>, vector<8x128xf32>
      %cst = arith.constant dense<0.000000e+00> : vector<8xf32>
      %23 = vector.multi_reduction <add>, %22, %cst [1] : vector<8x128xf32> to vector<8xf32>
      %24 = vector.shape_cast %23 : vector<8xf32> to vector<8x1xf32>
      %c0_23 = arith.constant 0 : index
      %c0_24 = arith.constant 0 : index
      %25 = vector.load %arg3[%c0_23, %c0_24] : memref<8x2xf32, #tpu.memory_space<vmem>>, vector<8x1xf32>
      tpu.vector_store %arg3[%c0_23, %c0_24], %24 {strides = array<i32>} : memref<8x2xf32, #tpu.memory_space<vmem>>, vector<8x1xf32>,
      %c0_25 = arith.constant 0 : index
      %c0_26 = arith.constant 0 : index
      %26 = vector.load %arg5[%c0_25, %c0_26] : memref<8x128xf32, #tpu.memory_space<vmem>>, vector<8x128xf32>
      %cst_27 = arith.constant dense<0.000000e+00> : vector<8xf32>
      %27 = vector.multi_reduction <add>, %26, %cst_27 [1] : vector<8x128xf32> to vector<8xf32>
      %28 = vector.shape_cast %27 : vector<8xf32> to vector<8x1xf32>
      %c0_28 = arith.constant 0 : index
      %c1 = arith.constant 1 : index
      %29 = vector.load %arg3[%c0_28, %c1] : memref<8x2xf32, #tpu.memory_space<vmem>>, vector<8x1xf32>
      tpu.vector_store %arg3[%c0_28, %c1], %28 {strides = array<i32>} : memref<8x2xf32, #tpu.memory_space<vmem>>, vector<8x1xf32>,
    } else {
    }
    return
  }
  func.func @transform_0(%arg0: i32, %arg1: i32) -> (i32, i32) {
    %c0_i32 = arith.constant 0 : i32
    return %arg0, %arg1 : i32, i32
  }
  func.func @transform_1(%arg0: i32, %arg1: i32) -> (i32, i32) {
    %c0_i32 = arith.constant 0 : i32
    %c0_i32_0 = arith.constant 0 : i32
    return %arg0, %c0_i32 : i32, i32
  }
}

module attributes {stable_mosaic.version = 11 : i64} {
  func.func @_bn_apply_kernel(%arg0: i32, %arg1: i32, %arg2: memref<8x256xf32, #tpu.memory_space<vmem>>, %arg3: memref<8x1xf32, #tpu.memory_space<vmem>>, %arg4: memref<8x1xf32, #tpu.memory_space<vmem>>, %arg5: memref<8x256xf32, #tpu.memory_space<vmem>>) attributes {dimension_semantics = [#tpu.dimension_semantics<parallel>, #tpu.dimension_semantics<parallel>], iteration_bounds = array<i64: 1, 1>, scalar_prefetch = 0 : i64, scratch_operands = 0 : i64, tpu.core_type = #tpu.core_type<tc>, window_params = [{transform_indices = @transform_0, window_bounds = array<i64: 8, 256>}, {transform_indices = @transform_1, window_bounds = array<i64: 8, 1>}, {transform_indices = @transform_2, window_bounds = array<i64: 8, 1>}, {transform_indices = @transform_3, window_bounds = array<i64: 8, 256>}]} {
    %c0 = arith.constant 0 : index
    %c0_0 = arith.constant 0 : index
    %0 = vector.load %arg2[%c0, %c0_0] : memref<8x256xf32, #tpu.memory_space<vmem>>, vector<8x256xf32>
    %c0_1 = arith.constant 0 : index
    %c0_2 = arith.constant 0 : index
    %1 = vector.load %arg3[%c0_1, %c0_2] : memref<8x1xf32, #tpu.memory_space<vmem>>, vector<8x1xf32>
    %2 = vector.broadcast %1 : vector<8x1xf32> to vector<8x256xf32>
    %3 = arith.mulf %0, %2 : vector<8x256xf32>
    %c0_3 = arith.constant 0 : index
    %c0_4 = arith.constant 0 : index
    %4 = vector.load %arg4[%c0_3, %c0_4] : memref<8x1xf32, #tpu.memory_space<vmem>>, vector<8x1xf32>
    %5 = vector.broadcast %4 : vector<8x1xf32> to vector<8x256xf32>
    %6 = arith.addf %3, %5 : vector<8x256xf32>
    %c0_5 = arith.constant 0 : index
    %c0_6 = arith.constant 0 : index
    %7 = vector.load %arg5[%c0_5, %c0_6] : memref<8x256xf32, #tpu.memory_space<vmem>>, vector<8x256xf32>
    tpu.vector_store %arg5[%c0_5, %c0_6], %6 {strides = array<i32>} : memref<8x256xf32, #tpu.memory_space<vmem>>, vector<8x256xf32>,
    return
  }
  func.func @transform_0(%arg0: i32, %arg1: i32) -> (i32, i32) {
    %c0_i32 = arith.constant 0 : i32
    return %arg0, %arg1 : i32, i32
  }
  func.func @transform_1(%arg0: i32, %arg1: i32) -> (i32, i32) {
    %c0_i32 = arith.constant 0 : i32
    %c0_i32_0 = arith.constant 0 : i32
    return %arg0, %c0_i32 : i32, i32
  }
  func.func @transform_2(%arg0: i32, %arg1: i32) -> (i32, i32) {
    %c0_i32 = arith.constant 0 : i32
    %c0_i32_0 = arith.constant 0 : i32
    return %arg0, %c0_i32 : i32, i32
  }
  func.func @transform_3(%arg0: i32, %arg1: i32) -> (i32, i32) {
    %c0_i32 = arith.constant 0 : i32
    return %arg0, %arg1 : i32, i32
  }
}

</mosaic_0001>

<bundles_post_ra>
// kernel: batchnorm2d_train.2
= control target key start
LH: loop header
LB: loop body
LE: loop exit
PB: predicated region body
PF: predicated region fallthrough
CT: control target
= control target key end

     0   :  { %vm36_vm0 = vcmask 7168   ;;  %vm41_vm1 = vcmask 15368   ;;  %s69_s0 = inlined_call_operand.vmem [shape: f32[8,256], index: 0, kind: input, shape index: {}]   ;;  %s70_s1 = inlined_call_operand.vmem [shape: f32[8,2], index: 1, kind: output, shape index: {}]  }
   0x1   :  { %v14_v0 = vld [vmem:[%s69_s0] sm:$0xff]  ;;  %v22_v1 = vld [vmem:[%s69_s0 + $0x8] sm:$0xff] }
   0x2   :  { %v24_v2 = vadd.f32 %v22_v1, %v14_v0  ;;  %v27_v3 = vmul.f32 %v22_v1, %v22_v1  ;;  %v19_v4 = vmul.f32 %v14_v0, %v14_v0 }
   0x4   :  { %34 = vadd.xlane.f32.xlu0 %v24_v2  ;;  %v28_v5 = vadd.f32 %v27_v3, %v19_v4 }
   0x8   :  { %39 = vadd.xlane.f32.xlu0 %v28_v5 }
  0x8d   :  { %v35_v6 = vpop.xlane.xlu0 %34 }
  0x8e   :  { %37 = vst.msk [vmem:[%s70_s1] sm:$0xff] %vm36_vm0, %v35_v6 }
  0x91   :  { %v40_v7 = vpop.xlane.xlu0 %39 }
  0x92   :  { %42 = vst.msk [vmem:[%s70_s1] sm:$0xff] %vm41_vm1, %v40_v7 }

// kernel: batchnorm2d_train.3
= control target key start
LH: loop header
LB: loop body
LE: loop exit
PB: predicated region body
PF: predicated region fallthrough
CT: control target
= control target key end

     0   :  { %v40_v0 = vmov 0   ;;  %s79_s1 = inlined_call_operand.vmem [shape: f32[8,1], index: 1, kind: input, shape index: {}]   ;;  %s80_s2 = inlined_call_operand.vmem [shape: f32[8,1], index: 2, kind: input, shape index: {}]   ;;  %s81_s0 = inlined_call_operand.vmem [shape: f32[8,256], index: 0, kind: input, shape index: {}]   ;;  %s82_s3 = inlined_call_operand.vmem [shape: f32[8,256], index: 3, kind: output, shape index: {}]  }
   0x1   :  { %39 = vset.pattern.permute.xlu0 %v40_v0  ;;  %v16_v1 = vld [vmem:[%s79_s1] sm:$0xff]  ;;  %v15_v5 = vld [vmem:[%s81_s0 + $0x8] sm:$0xff] }
   0x2   :  { %19 = vperm.xlu0 %39, %v16_v1   ;;  %v24_v2 = vld [vmem:[%s80_s2] sm:$0xff] }
   0x3   :  { %v14_v4 = vld [vmem:[%s81_s0] sm:$0xff] }
   0x6   :  { %27 = vperm.xlu0 %39, %v24_v2  }
  0x7d   :  { %v20_v3 = vpop.permute.xlu0 %19 }
  0x7e   :  { %v22_v6 = vmul.f32 %v20_v3, %v14_v4  ;;  %v23_v7 = vmul.f32 %v20_v3, %v15_v5 }
  0x81   :  { %v28_v8 = vpop.permute.xlu0 %27 }
  0x82   :  { %v30_v9 = vadd.f32 %v28_v8, %v22_v6  ;;  %v31_v10 = vadd.f32 %v28_v8, %v23_v7 }
  0x84   :  { %32 = vst [vmem:[%s82_s3] sm:$0xff] %v30_v9  ;;  %33 = vst [vmem:[%s82_s3 + $0x8] sm:$0xff] %v31_v10 }

</bundles_post_ra>
